<compile_context>
chip_gen: v7x
topology: tpu7x:2x2x1
jax: 0.10.0
libtpu: 0.0.40
codegen_flags: <defaults>
</compile_context>

<pallas_src>
import jax
import jax.numpy as jnp
from jax.experimental import pallas as pl
from jax.experimental.pallas import tpu as pltpu

IN_FEATURES = 28 * 28    # 784 (full-array lane dim; v5e could pad to 896, minor)
HIDDEN = 500
HIDDEN_PADDED = 512      # lane-dense hidden (multiple of 128)
OUT_FEATURES = 10
OUT_PADDED = 128         # lane-dense output slab (multiple of 128)


def _round_up(n, m):
    return ((n + m - 1) // m) * m


def _mlp_kernel(x_ref, w1_ref, b1_ref, w2_ref, b2_ref, out_ref):
    # fc1: (TB,784)f32 -> bf16 cast in-kernel, (784,512)bf16 -> f32 acc, +b, ReLU
    x_bf = x_ref[...].astype(jnp.bfloat16)
    h = jnp.dot(x_bf, w1_ref[...], preferred_element_type=jnp.float32)
    h = jnp.maximum(h + b1_ref[...], 0.0)
    # fc2: (TB,512)bf16 @ (512,128)bf16 -> f32 acc, + bias, store bf16 lane-dense
    o = jnp.dot(h.astype(jnp.bfloat16), w2_ref[...],
                preferred_element_type=jnp.float32)
    out_ref[...] = (o + b2_ref[...]).astype(jnp.bfloat16)


def prepare_params(w1, b1, w2, b2):
    """One-time parameter prep (hoisted out of the per-call forward).

    w1: (784, 500)  b1: (500,)   w2: (500, 10)  b2: (10,)
    Returns bf16 weights padded to (784,512)/(1,512)/(512,128)/(1,128); the
    padded hidden lanes produce ReLU(0)=0 and contribute nothing to fc2, and
    padded output lanes are exactly 0 and are sliced off in net_forward.
    """
    w1_p = jnp.zeros((IN_FEATURES, HIDDEN_PADDED), jnp.bfloat16)
    w1_p = w1_p.at[:, :HIDDEN].set(w1.astype(jnp.bfloat16))
    b1_p = jnp.zeros((1, HIDDEN_PADDED), jnp.float32)
    b1_p = b1_p.at[:, :HIDDEN].set(b1.astype(jnp.float32))
    w2_p = jnp.zeros((HIDDEN_PADDED, OUT_PADDED), jnp.bfloat16)
    w2_p = w2_p.at[:HIDDEN, :OUT_FEATURES].set(w2.astype(jnp.bfloat16))
    b2_p = jnp.zeros((1, OUT_PADDED), jnp.float32)
    b2_p = b2_p.at[:, :OUT_FEATURES].set(b2.astype(jnp.float32))
    return w1_p, b1_p, w2_p, b2_p


def net_forward(x, params, *, tile_b=2048):
    """Pallas forward pass of the PyTorch `Net` module.

    x      : (B, 1, 28, 28) or (B, 784) float32
    params : output of prepare_params(w1, b1, w2, b2)
    returns (B, 10) float32
    """
    w1_p, b1_p, w2_p, b2_p = params
    x2d = x.reshape(-1, IN_FEATURES).astype(jnp.float32)   # glue: x.view(-1, 784)
    B = x2d.shape[0]

    # Balanced tiling: minimal ragged padding (< num_tiles*8 extra rows), and
    # >= 2 grid steps for mid/large batches so v7x's two TensorCores both work.
    num_tiles = max(1, pl.cdiv(B, tile_b))
    if num_tiles == 1 and B >= 256:
        num_tiles = 2
    tb = _round_up(pl.cdiv(B, num_tiles), 8)   # sublane multiple
    b_pad = num_tiles * tb
    if b_pad != B:
        # Only the ragged remainder is padded (padded rows are sliced off below;
        # they must never be consumed directly).
        x2d = jnp.pad(x2d, ((0, b_pad - B), (0, 0)))

    grid = (num_tiles,)

    flops = 2 * b_pad * IN_FEATURES * HIDDEN_PADDED + 2 * b_pad * HIDDEN_PADDED * OUT_PADDED
    bytes_accessed = (b_pad * IN_FEATURES * 4          # x (f32 read)
                      + w1_p.size * 2 + b1_p.size * 4
                      + w2_p.size * 2 + b2_p.size * 4
                      + b_pad * OUT_PADDED * 2)        # out (bf16 write)

    out = pl.pallas_call(
        _mlp_kernel,
        out_shape=jax.ShapeDtypeStruct((b_pad, OUT_PADDED), jnp.bfloat16),
        grid=grid,
        in_specs=[
            pl.BlockSpec((tb, IN_FEATURES), lambda i: (i, 0)),            # x tile
            pl.BlockSpec((IN_FEATURES, HIDDEN_PADDED), lambda i: (0, 0)), # w1 (resident)
            pl.BlockSpec((1, HIDDEN_PADDED), lambda i: (0, 0)),           # b1 (resident)
            pl.BlockSpec((HIDDEN_PADDED, OUT_PADDED), lambda i: (0, 0)),  # w2 (resident)
            pl.BlockSpec((1, OUT_PADDED), lambda i: (0, 0)),              # b2 (resident)
        ],
        out_specs=pl.BlockSpec((tb, OUT_PADDED), lambda i: (i, 0)),
        compiler_params=pltpu.CompilerParams(
            dimension_semantics=("parallel",),
            # ~25 MiB needed at tb=2048 (x f32 double-buffer dominates); 48 MiB
            # keeps headroom and still fits v7x's 64 MiB VMEM.
            vmem_limit_bytes=48 << 20,
        ),
        cost_estimate=pl.CostEstimate(
            flops=flops, transcendentals=0, bytes_accessed=bytes_accessed),
    )(x2d, w1_p, b1_p, w2_p, b2_p)

    return out[:B, :OUT_FEATURES].astype(jnp.float32)


def _ref_forward(x, w1, b1, w2, b2):
    # Pure-JAX reference following the same bf16-operand / f32-accumulate math.
    x2d = x.reshape(-1, IN_FEATURES)
    h = jnp.dot(x2d.astype(jnp.bfloat16), w1.astype(jnp.bfloat16),
                preferred_element_type=jnp.float32) + b1.astype(jnp.float32)
    h = jnp.maximum(h, 0.0)
    o = jnp.dot(h.astype(jnp.bfloat16), w2.astype(jnp.bfloat16),
                preferred_element_type=jnp.float32) + b2.astype(jnp.float32)
    return o


if __name__ == "__main__":
    key = jax.random.PRNGKey(0)
    kx, kw1, kb1, kw2, kb2 = jax.random.split(key, 5)

    B = 8
    # Input images, NCHW like the PyTorch module expects.
    x = jax.random.normal(kx, (B, 1, 28, 28), dtype=jnp.float32)

    # Deterministic parameter init (shapes match nn.Linear(784,500)/(500,10);
    # weights stored transposed as (in, out) for the kernel).
    w1 = jax.random.normal(kw1, (IN_FEATURES, HIDDEN), dtype=jnp.float32) * 0.02
    b1 = jax.random.normal(kb1, (HIDDEN,), dtype=jnp.float32) * 0.02
    w2 = jax.random.normal(kw2, (HIDDEN, OUT_FEATURES), dtype=jnp.float32) * 0.02
    b2 = jax.random.normal(kb2, (OUT_FEATURES,), dtype=jnp.float32) * 0.02

    params = prepare_params(w1, b1, w2, b2)   # one-time weight prep
    out = net_forward(x, params)
    out = jax.block_until_ready(out)

    ref = _ref_forward(x, w1, b1, w2, b2)
    assert out.shape == (B, OUT_FEATURES)
    assert jnp.allclose(out, ref, atol=2e-2, rtol=2e-2), (
        f"max abs err {float(jnp.max(jnp.abs(out - ref)))}")

    print("KERNEL_OK")
</pallas_src>

<mosaic_0001>
module attributes {stable_mosaic.version = 11 : i64} {
  func.func @_mlp_kernel(%arg0: i32, %arg1: memref<8x784xf32, #tpu.memory_space<vmem>>, %arg2: memref<784x512xbf16, #tpu.memory_space<vmem>>, %arg3: memref<1x512xf32, #tpu.memory_space<vmem>>, %arg4: memref<512x128xbf16, #tpu.memory_space<vmem>>, %arg5: memref<1x128xf32, #tpu.memory_space<vmem>>, %arg6: memref<8x128xbf16, #tpu.memory_space<vmem>>) attributes {dimension_semantics = [#tpu.dimension_semantics<parallel>], iteration_bounds = array<i64: 1>, scalar_prefetch = 0 : i64, scratch_operands = 0 : i64, tpu.core_type = #tpu.core_type<tc>, window_params = [{transform_indices = @transform_0, window_bounds = array<i64: 8, 784>}, {pipeline_mode = #tpu.pipeline_mode<synchronous>, transform_indices = @transform_1, window_bounds = array<i64: 784, 512>}, {pipeline_mode = #tpu.pipeline_mode<synchronous>, transform_indices = @transform_2, window_bounds = array<i64: 1, 512>}, {pipeline_mode = #tpu.pipeline_mode<synchronous>, transform_indices = @transform_3, window_bounds = array<i64: 512, 128>}, {pipeline_mode = #tpu.pipeline_mode<synchronous>, transform_indices = @transform_4, window_bounds = array<i64: 1, 128>}, {transform_indices = @transform_5, window_bounds = array<i64: 8, 128>}]} {
    %c0 = arith.constant 0 : index
    %c0_0 = arith.constant 0 : index
    %0 = vector.load %arg1[%c0, %c0_0] : memref<8x784xf32, #tpu.memory_space<vmem>>, vector<8x784xf32>
    %1 = arith.truncf %0 : vector<8x784xf32> to vector<8x784xbf16>
    %c0_1 = arith.constant 0 : index
    %c0_2 = arith.constant 0 : index
    %2 = vector.load %arg2[%c0_1, %c0_2] : memref<784x512xbf16, #tpu.memory_space<vmem>>, vector<784x512xbf16>
    %cst = arith.constant dense<0.000000e+00> : vector<8x512xf32>
    %3 = tpu.matmul %1, %2, %cst {dimension_numbers = #tpu.dot_dimension_numbers<[1], [0], [0], [1], [0, 0, 1, 1], [], []>} : vector<8x784xbf16>, vector<784x512xbf16>, vector<8x512xf32> -> vector<8x512xf32>
    %c0_3 = arith.constant 0 : index
    %c0_4 = arith.constant 0 : index
    %4 = vector.load %arg3[%c0_3, %c0_4] : memref<1x512xf32, #tpu.memory_space<vmem>>, vector<1x512xf32>
    %5 = vector.broadcast %4 : vector<1x512xf32> to vector<8x512xf32>
    %6 = arith.addf %3, %5 : vector<8x512xf32>
    %cst_5 = arith.constant 0.000000e+00 : f32
    %7 = vector.broadcast %cst_5 : f32 to vector<8x512xf32>
    %8 = arith.maximumf %6, %7 : vector<8x512xf32>
    %9 = arith.truncf %8 : vector<8x512xf32> to vector<8x512xbf16>
    %c0_6 = arith.constant 0 : index
    %c0_7 = arith.constant 0 : index
    %10 = vector.load %arg4[%c0_6, %c0_7] : memref<512x128xbf16, #tpu.memory_space<vmem>>, vector<512x128xbf16>
    %cst_8 = arith.constant dense<0.000000e+00> : vector<8x128xf32>
    %11 = tpu.matmul %9, %10, %cst_8 {dimension_numbers = #tpu.dot_dimension_numbers<[1], [0], [0], [1], [0, 0, 1, 1], [], []>} : vector<8x512xbf16>, vector<512x128xbf16>, vector<8x128xf32> -> vector<8x128xf32>
    %c0_9 = arith.constant 0 : index
    %c0_10 = arith.constant 0 : index
    %12 = vector.load %arg5[%c0_9, %c0_10] : memref<1x128xf32, #tpu.memory_space<vmem>>, vector<1x128xf32>
    %13 = vector.broadcast %12 : vector<1x128xf32> to vector<8x128xf32>
    %14 = arith.addf %11, %13 : vector<8x128xf32>
    %15 = arith.truncf %14 : vector<8x128xf32> to vector<8x128xbf16>
    %c0_11 = arith.constant 0 : index
    %c0_12 = arith.constant 0 : index
    %16 = vector.load %arg6[%c0_11, %c0_12] : memref<8x128xbf16, #tpu.memory_space<vmem>>, vector<8x128xbf16>
    tpu.vector_store %arg6[%c0_11, %c0_12], %15 {strides = array<i32>} : memref<8x128xbf16, #tpu.memory_space<vmem>>, vector<8x128xbf16>,
    return
  }
  func.func @transform_0(%arg0: i32) -> (i32, i32) {
    %c0_i32 = arith.constant 0 : i32
    %c0_i32_0 = arith.constant 0 : i32
    return %arg0, %c0_i32 : i32, i32
  }
  func.func @transform_1(%arg0: i32) -> (i32, i32) {
    %c0_i32 = arith.constant 0 : i32
    %c0_i32_0 = arith.constant 0 : i32
    %c0_i32_1 = arith.constant 0 : i32
    return %c0_i32, %c0_i32_0 : i32, i32
  }
  func.func @transform_2(%arg0: i32) -> (i32, i32) {
    %c0_i32 = arith.constant 0 : i32
    %c0_i32_0 = arith.constant 0 : i32
    %c0_i32_1 = arith.constant 0 : i32
    return %c0_i32, %c0_i32_0 : i32, i32
  }
  func.func @transform_3(%arg0: i32) -> (i32, i32) {
    %c0_i32 = arith.constant 0 : i32
    %c0_i32_0 = arith.constant 0 : i32
    %c0_i32_1 = arith.constant 0 : i32
    return %c0_i32, %c0_i32_0 : i32, i32
  }
  func.func @transform_4(%arg0: i32) -> (i32, i32) {
    %c0_i32 = arith.constant 0 : i32
    %c0_i32_0 = arith.constant 0 : i32
    %c0_i32_1 = arith.constant 0 : i32
    return %c0_i32, %c0_i32_0 : i32, i32
  }
  func.func @transform_5(%arg0: i32) -> (i32, i32) {
    %c0_i32 = arith.constant 0 : i32
    %c0_i32_0 = arith.constant 0 : i32
    return %arg0, %c0_i32 : i32, i32
  }
}

</mosaic_0001>

<bundles_post_ra>
// kernel: tpu_custom_call.1
= control target key start
LH: loop header
LB: loop body
LE: loop exit
PB: predicated region body
PF: predicated region fallthrough
CT: control target
= control target key end

     0   :  { %10 = vsyncpa [#allocation3], 0  ;;  %s2799_s0 = inlined_call_operand.hbm [shape: f32[8,784], index: 0, kind: input, shape index: {}]   ;;  %s2800_s1 = inlined_call_operand.hbm [shape: bf16[784,512], index: 1, kind: input, shape index: {}]   ;;  %s2801_s2 = inlined_call_operand.vmem [shape: f32[1,512], index: 2, kind: input, shape index: {}]   ;;  %s2802_s3 = inlined_call_operand.hbm [shape: bf16[512,128], index: 3, kind: input, shape index: {}]   ;;  %s2803_s4 = inlined_call_operand.vmem [shape: f32[1,128], index: 4, kind: input, shape index: {}]   ;;  %s2804_s5 = inlined_call_operand.hbm [shape: bf16[8,128], index: 5, kind: output, shape index: {}]  }
   0x1   :  { %11 = vsyncpa [#allocation6], 0 }
   0x2   :  { %12 = vsyncpa [#allocation4], 0  ;;  %s2706_s18 = smov [#allocation5]   ;;  %s2612_s22 = scalar_lea.hbm %s2800_s1, 25088 }
   0x3   :  { %s28_s19 = sshll.u32 %s2706_s18, 4  ;;  %p2613_p0 = scmp.ne.s32.totalorder %s2800_s1, %s2612_s22  ;;  %s29_s19 = int_to_ptr.vmem [resolvable:$true] %s28_s19 }
   0x4   :  { %p2616_p1 = scmp.lt.u32.totalorder %s2612_s22, %s2800_s1 }
   0x6   :  { %p2618_p2 = pnand %p2616_p1, %p2613_p0 }
   0x8   :  { %2621 = shalt.err (!%p2618_p2)
}
   0x9   :  { %s2622_s27 = scalar_lea.vmem %s29_s19, 25088  ;;  %p2627_p4 = scmp.lt.s32.totalorder %s29_s19, %s29_s19 }
   0xa   :  { %p2623_p3 = scmp.ne.s32.totalorder %s29_s19, %s2622_s27  ;;  %p2628_p5 = scmp.lt.s32.totalorder %s2622_s27, %s2622_s27 }
   0xc   :  { %p2629_p6 = por %p2628_p5, %p2627_p4 }
   0xe   :  { %p2630_p7 = pnand %p2629_p6, %p2623_p3 }
  0x10   :  { %2633 = shalt.err (!%p2630_p7)
}
  0x11   :  { %s2707_s28 = smov 256   ;;  %s2708_s29 = smov 16  }
  0x12   :  { %34 = dma.hbm_to_vmem [thread:$0]  %s2800_s1, 25088, %s29_s19, [#allocation6], %s2707_s28, %s2707_s28, %s2708_s29  }
  0x13   :  { %s2709_s7 = smov [#allocation2]   ;;  %s2710_s9 = smov [#allocation7]  }
  0x14   :  { %s19_s8 = sshll.u32 %s2709_s7, 4  ;;  %s42_s10 = sshll.u32 %s2710_s9, 4  ;;  %s20_s8 = int_to_ptr.vmem [resolvable:$true] %s19_s8  ;;  %s43_s10 = int_to_ptr.vmem [resolvable:$true] %s42_s10 }
  0x15   :  { %s2634_s13 = scalar_lea.hbm %s2799_s0, 896 }
  0x16   :  { %p2635_p8 = scmp.ne.s32.totalorder %s2799_s0, %s2634_s13  ;;  %p2638_p9 = scmp.lt.u32.totalorder %s2634_s13, %s2799_s0 }
  0x18   :  { %p2640_p10 = pnand %p2638_p9, %p2635_p8 }
  0x1a   :  { %2643 = shalt.err (!%p2640_p10)
}
  0x1b   :  { %s2644_s1 = scalar_lea.vmem %s20_s8, 896  ;;  %p2649_p12 = scmp.lt.s32.totalorder %s20_s8, %s20_s8 }
  0x1c   :  { %p2645_p11 = scmp.ne.s32.totalorder %s20_s8, %s2644_s1  ;;  %p2650_p13 = scmp.lt.s32.totalorder %s2644_s1, %s2644_s1 }
  0x1e   :  { %p2651_p0 = por %p2650_p13, %p2649_p12 }
  0x20   :  { %p2652_p1 = pnand %p2651_p0, %p2645_p11 }
  0x22   :  { %2655 = shalt.err (!%p2652_p1)
}
  0x23   :  { %22 = dma.hbm_to_vmem [thread:$0]  %s2799_s0, 896, %s20_s8, [#allocation3]  }
  0x24   :  { %s2656_s22 = scalar_lea.hbm %s2802_s3, 4096 }
  0x25   :  { %p2657_p2 = scmp.ne.s32.totalorder %s2802_s3, %s2656_s22  ;;  %p2660_p3 = scmp.lt.u32.totalorder %s2656_s22, %s2802_s3 }
  0x27   :  { %p2662_p4 = pnand %p2660_p3, %p2657_p2 }
  0x29   :  { %2665 = shalt.err (!%p2662_p4)
}
  0x2a   :  { %s2666_s27 = scalar_lea.vmem %s43_s10, 4096  ;;  %p2671_p6 = scmp.lt.s32.totalorder %s43_s10, %s43_s10 }
  0x2b   :  { %p2667_p5 = scmp.ne.s32.totalorder %s43_s10, %s2666_s27  ;;  %p2672_p7 = scmp.lt.s32.totalorder %s2666_s27, %s2666_s27 }
  0x2d   :  { %p2673_p8 = por %p2672_p7, %p2671_p6 }
  0x2f   :  { %p2674_p9 = pnand %p2673_p8, %p2667_p5 }
  0x31   :  { %2677 = shalt.err (!%p2674_p9)
}
  0x32   :  { %s2711_s0 = smov 64   ;;  %s2712_s28 = smov 4  }
  0x33   :  { %48 = dma.hbm_to_vmem [thread:$0]  %s2802_s3, 4096, %s43_s10, [#allocation6], %s2711_s0, %s2711_s0, %s2712_s28  }
  0x34   :  { %2700 = dma.done.wait [#allocation3], 896  }
  0x35   :  { %2701 = vsyncadd [#allocation3], 4294966400 }
  0x36   :  { %2702 = dma.done.wait [#allocation6], 29184  }
  0x37   :  { %2703 = vsyncadd [#allocation6], 4294938112  ;;  %v2286_v0 = vld [vmem:[#allocation5 + $0x4] ss:$16 sps:$4 sm:$0xff]   ;;  %v2288_v1 = vld [vmem:[#allocation5 + $0xc] ss:$16 sps:$4 sm:$0xff]  }
  0x38   :  { %1277 = vmatprep.subr.bf16.mxu0 %v2286_v0  ;;  %v2290_v2 = vld [vmem:[#allocation5] ss:$16 sps:$4 sm:$0xff]   ;;  %v2291_v3 = vld [vmem:[#allocation5 + $0x8] ss:$16 sps:$4 sm:$0xff]   ;;  %1441 = vmatprep.subr.bf16.mxu1 %v2288_v1  ;;  %v2292_v4 = vld [vmem:[#allocation5 + $0x24] ss:$16 sps:$4 sm:$0xff]  }
  0x39   :  { %1278 = vmatpush1.bf16.msra.mxu0 %v2290_v2  ;;  %1442 = vmatpush1.bf16.msra.mxu1 %v2291_v3  ;;  %v2294_v5 = vld [vmem:[#allocation5 + $0x2c] ss:$16 sps:$4 sm:$0xff]   ;;  %v2296_v6 = vld [vmem:[#allocation5 + $0x20] ss:$16 sps:$4 sm:$0xff]   ;;  %v2297_v7 = vld [vmem:[#allocation5 + $0x28] ss:$16 sps:$4 sm:$0xff]  }
  0x3a   :  { %1279 = vmatprep.subr.bf16.mxu0 %v2292_v4  ;;  %1443 = vmatprep.subr.bf16.mxu1 %v2294_v5  ;;  %v2298_v8 = vld [vmem:[#allocation5 + $0x44] ss:$16 sps:$4 sm:$0xff]   ;;  %v2300_v9 = vld [vmem:[#allocation5 + $0x4c] ss:$16 sps:$4 sm:$0xff]   ;;  %v2302_v10 = vld [vmem:[#allocation5 + $0x40] ss:$16 sps:$4 sm:$0xff]  }
  0x3b   :  { %v2303_v11 = vld [vmem:[#allocation5 + $0x48] ss:$16 sps:$4 sm:$0xff]   ;;  %v2304_v12 = vld [vmem:[#allocation5 + $0x64] ss:$16 sps:$4 sm:$0xff]   ;;  %v2306_v13 = vld [vmem:[#allocation5 + $0x6c] ss:$16 sps:$4 sm:$0xff]  }
  0x3c   :  { %v2308_v14 = vld [vmem:[#allocation5 + $0x60] ss:$16 sps:$4 sm:$0xff]   ;;  %v2309_v15 = vld [vmem:[#allocation5 + $0x68] ss:$16 sps:$4 sm:$0xff]   ;;  %v2310_v16 = vld [vmem:[#allocation5 + $0x84] ss:$16 sps:$4 sm:$0xff]  }
  0x3d   :  { %1280 = vmatpush1.bf16.msra.mxu0 %v2296_v6  ;;  %1444 = vmatpush1.bf16.msra.mxu1 %v2297_v7  ;;  %v2312_v17 = vld [vmem:[#allocation5 + $0x8c] ss:$16 sps:$4 sm:$0xff]   ;;  %v2314_v18 = vld [vmem:[#allocation5 + $0x80] ss:$16 sps:$4 sm:$0xff]   ;;  %v2315_v19 = vld [vmem:[#allocation5 + $0x88] ss:$16 sps:$4 sm:$0xff]  }
  0x3e   :  { %1281 = vmatprep.subr.bf16.mxu0 %v2298_v8  ;;  %1445 = vmatprep.subr.bf16.mxu1 %v2300_v9  ;;  %v2316_v20 = vld [vmem:[#allocation5 + $0xa4] ss:$16 sps:$4 sm:$0xff]   ;;  %v2318_v21 = vld [vmem:[#allocation5 + $0xac] ss:$16 sps:$4 sm:$0xff]   ;;  %v2320_v22 = vld [vmem:[#allocation5 + $0xa0] ss:$16 sps:$4 sm:$0xff]  }
  0x3f   :  { %v2321_v23 = vld [vmem:[#allocation5 + $0xa8] ss:$16 sps:$4 sm:$0xff]   ;;  %v2322_v24 = vld [vmem:[#allocation5 + $0xc4] ss:$16 sps:$4 sm:$0xff]   ;;  %v2324_v25 = vld [vmem:[#allocation5 + $0xcc] ss:$16 sps:$4 sm:$0xff]  }
  0x40   :  { %v2326_v26 = vld [vmem:[#allocation5 + $0xc0] ss:$16 sps:$4 sm:$0xff]   ;;  %v2327_v27 = vld [vmem:[#allocation5 + $0xc8] ss:$16 sps:$4 sm:$0xff]   ;;  %v2328_v28 = vld [vmem:[#allocation5 + $0xe4] ss:$16 sps:$4 sm:$0xff]  }
  0x41   :  { %1282 = vmatpush1.bf16.msra.mxu0 %v2302_v10  ;;  %1446 = vmatpush1.bf16.msra.mxu1 %v2303_v11  ;;  %v2330_v29 = vld [vmem:[#allocation5 + $0xec] ss:$16 sps:$4 sm:$0xff]   ;;  %v2332_v30 = vld [vmem:[#allocation5 + $0xe0] ss:$16 sps:$4 sm:$0xff]   ;;  %v2333_v31 = vld [vmem:[#allocation5 + $0xe8] ss:$16 sps:$4 sm:$0xff]  }
  0x42   :  { %1283 = vmatprep.subr.bf16.mxu0 %v2304_v12  ;;  %1447 = vmatprep.subr.bf16.mxu1 %v2306_v13  ;;  %v2334_v32 = vld [vmem:[#allocation5 + $0x104] ss:$16 sps:$4 sm:$0xff]   ;;  %v2336_v33 = vld [vmem:[#allocation5 + $0x10c] ss:$16 sps:$4 sm:$0xff]   ;;  %v2338_v34 = vld [vmem:[#allocation5 + $0x100] ss:$16 sps:$4 sm:$0xff]  }
  0x43   :  { %v2339_v35 = vld [vmem:[#allocation5 + $0x108] ss:$16 sps:$4 sm:$0xff]   ;;  %v2340_v36 = vld [vmem:[#allocation5 + $0x124] ss:$16 sps:$4 sm:$0xff]   ;;  %v2342_v37 = vld [vmem:[#allocation5 + $0x12c] ss:$16 sps:$4 sm:$0xff]  }
  0x44   :  { %v2344_v38 = vld [vmem:[#allocation5 + $0x120] ss:$16 sps:$4 sm:$0xff]   ;;  %v2345_v39 = vld [vmem:[#allocation5 + $0x128] ss:$16 sps:$4 sm:$0xff]   ;;  %v2346_v40 = vld [vmem:[#allocation5 + $0x144] ss:$16 sps:$4 sm:$0xff]  }
  0x45   :  { %1284 = vmatpush1.bf16.msra.mxu0 %v2308_v14  ;;  %1448 = vmatpush1.bf16.msra.mxu1 %v2309_v15  ;;  %v2348_v41 = vld [vmem:[#allocation5 + $0x14c] ss:$16 sps:$4 sm:$0xff]   ;;  %v2350_v42 = vld [vmem:[#allocation5 + $0x140] ss:$16 sps:$4 sm:$0xff]   ;;  %v2351_v43 = vld [vmem:[#allocation5 + $0x148] ss:$16 sps:$4 sm:$0xff]  }
  0x46   :  { %1285 = vmatprep.subr.bf16.mxu0 %v2310_v16  ;;  %1449 = vmatprep.subr.bf16.mxu1 %v2312_v17  ;;  %v2352_v44 = vld [vmem:[#allocation5 + $0x164] ss:$16 sps:$4 sm:$0xff]   ;;  %v2354_v45 = vld [vmem:[#allocation5 + $0x16c] ss:$16 sps:$4 sm:$0xff]   ;;  %v2356_v47 = vld [vmem:[#allocation5 + $0x160] ss:$16 sps:$4 sm:$0xff]  }
  0x47   :  { %v62_v46 = vld [vmem:[#allocation2 + $0x8] sm:$0xff]  ;;  %v2357_v49 = vld [vmem:[#allocation5 + $0x168] ss:$16 sps:$4 sm:$0xff]   ;;  %v2360_v51 = vld [vmem:[#allocation5 + $0x18c] ss:$16 sps:$4 sm:$0xff]   ;;  %vm1273_vm0 = vcmask 130048  }
  0x48   :  { %v69_v48 = vpack.c.bf16 %v62_v46, %v62_v46  ;;  %v2358_v50 = vld [vmem:[#allocation5 + $0x184] ss:$16 sps:$4 sm:$0xff]   ;;  %v2362_v52 = vld [vmem:[#allocation5 + $0x180] ss:$16 sps:$4 sm:$0xff]   ;;  %v2363_v53 = vld [vmem:[#allocation5 + $0x188] ss:$16 sps:$4 sm:$0xff]  }
  0x49   :  { %1286 = vmatpush1.bf16.msra.mxu0 %v2314_v18  ;;  %1450 = vmatpush1.bf16.msra.mxu1 %v2315_v19  ;;  %v2364_v54 = vld [vmem:[#allocation5 + $0x1a4] ss:$16 sps:$4 sm:$0xff]   ;;  %v2366_v55 = vld [vmem:[#allocation5 + $0x1ac] ss:$16 sps:$4 sm:$0xff]   ;;  %v2368_v56 = vld [vmem:[#allocation5 + $0x1a0] ss:$16 sps:$4 sm:$0xff]  }
  0x4a   :  { %1287 = vmatprep.subr.bf16.mxu0 %v2316_v20  ;;  %1451 = vmatprep.subr.bf16.mxu1 %v2318_v21  ;;  %v2369_v57 = vld [vmem:[#allocation5 + $0x1a8] ss:$16 sps:$4 sm:$0xff]   ;;  %v2370_v58 = vld [vmem:[#allocation5 + $0x1c4] ss:$16 sps:$4 sm:$0xff]   ;;  %v2372_v59 = vld [vmem:[#allocation5 + $0x1cc] ss:$16 sps:$4 sm:$0xff]  }
  0x4b   :  { %1309 = vmatprep.mubr.bf16.mxu0 %v69_v48  ;;  %1473 = vmatprep.mubr.bf16.mxu1 %v69_v48  ;;  %v2374_v60 = vld [vmem:[#allocation5 + $0x1c0] ss:$16 sps:$4 sm:$0xff]   ;;  %v2375_v61 = vld [vmem:[#allocation5 + $0x1c8] ss:$16 sps:$4 sm:$0xff]   ;;  %v2376_v62 = vld [vmem:[#allocation5 + $0x1e4] ss:$16 sps:$4 sm:$0xff]  }
  0x4c   :  { %v2378_v63 = vld [vmem:[#allocation5 + $0x1ec] ss:$16 sps:$4 sm:$0xff]   ;;  %v2380_v0 = vld [vmem:[#allocation5 + $0x1e0] ss:$16 sps:$4 sm:$0xff]   ;;  %v2381_v1 = vld [vmem:[#allocation5 + $0x1e8] ss:$16 sps:$4 sm:$0xff]  }
  0x4d   :  { %1288 = vmatpush1.bf16.msra.mxu0 %v2320_v22  ;;  %1452 = vmatpush1.bf16.msra.mxu1 %v2321_v23  ;;  %v61_v2 = vld [vmem:[#allocation2] sm:$0xff]  ;;  %v2384_v3 = vld [vmem:[#allocation5 + $0x204] ss:$16 sps:$4 sm:$0xff]   ;;  %v2382_v6 = vld [vmem:[#allocation5 + $0x200] ss:$16 sps:$4 sm:$0xff]   ;;  %s2714_s8 = smov [#allocation8]  }
  0x4e   :  { %1289 = vmatprep.subr.bf16.mxu0 %v2322_v24  ;;  %1453 = vmatprep.subr.bf16.mxu1 %v2324_v25  ;;  %v2387_v4 = vld [vmem:[#allocation5 + $0x20c] ss:$16 sps:$4 sm:$0xff]   ;;  %v68_v5 = vpack.c.bf16 %v61_v2, %v61_v2  ;;  %v2385_v7 = vld [vmem:[#allocation5 + $0x208] ss:$16 sps:$4 sm:$0xff]   ;;  %v2390_v8 = vld [vmem:[#allocation5 + $0x224] ss:$16 sps:$4 sm:$0xff]  }
  0x4f   :  { %v2393_v9 = vld [vmem:[#allocation5 + $0x22c] ss:$16 sps:$4 sm:$0xff]   ;;  %v2388_v10 = vld [vmem:[#allocation5 + $0x220] ss:$16 sps:$4 sm:$0xff]   ;;  %v2391_v11 = vld [vmem:[#allocation5 + $0x228] ss:$16 sps:$4 sm:$0xff]  }
  0x50   :  { %v2396_v12 = vld [vmem:[#allocation5 + $0x244] ss:$16 sps:$4 sm:$0xff]   ;;  %v2399_v13 = vld [vmem:[#allocation5 + $0x24c] ss:$16 sps:$4 sm:$0xff]   ;;  %v2394_v14 = vld [vmem:[#allocation5 + $0x240] ss:$16 sps:$4 sm:$0xff]  }
  0x51   :  { %1290 = vmatpush1.bf16.msra.mxu0 %v2326_v26  ;;  %1454 = vmatpush1.bf16.msra.mxu1 %v2327_v27  ;;  %v2397_v15 = vld [vmem:[#allocation5 + $0x248] ss:$16 sps:$4 sm:$0xff]   ;;  %v2402_v16 = vld [vmem:[#allocation5 + $0x264] ss:$16 sps:$4 sm:$0xff]   ;;  %v2405_v17 = vld [vmem:[#allocation5 + $0x26c] ss:$16 sps:$4 sm:$0xff]  }
  0x52   :  { %1291 = vmatprep.subr.bf16.mxu0 %v2328_v28  ;;  %1455 = vmatprep.subr.bf16.mxu1 %v2330_v29  ;;  %v2400_v18 = vld [vmem:[#allocation5 + $0x260] ss:$16 sps:$4 sm:$0xff]   ;;  %v2403_v19 = vld [vmem:[#allocation5 + $0x268] ss:$16 sps:$4 sm:$0xff]   ;;  %v2408_v20 = vld [vmem:[#allocation5 + $0x284] ss:$16 sps:$4 sm:$0xff]  }
  0x53   :  { %v2411_v21 = vld [vmem:[#allocation5 + $0x28c] ss:$16 sps:$4 sm:$0xff]   ;;  %v2406_v22 = vld [vmem:[#allocation5 + $0x280] ss:$16 sps:$4 sm:$0xff]   ;;  %v2409_v23 = vld [vmem:[#allocation5 + $0x288] ss:$16 sps:$4 sm:$0xff]  }
  0x54   :  { %v2414_v24 = vld [vmem:[#allocation5 + $0x2a4] ss:$16 sps:$4 sm:$0xff]   ;;  %v2417_v25 = vld [vmem:[#allocation5 + $0x2ac] ss:$16 sps:$4 sm:$0xff]   ;;  %v2412_v26 = vld [vmem:[#allocation5 + $0x2a0] ss:$16 sps:$4 sm:$0xff]  }
  0x55   :  { %1292 = vmatpush1.bf16.msra.mxu0 %v2332_v30  ;;  %1456 = vmatpush1.bf16.msra.mxu1 %v2333_v31  ;;  %v2415_v27 = vld [vmem:[#allocation5 + $0x2a8] ss:$16 sps:$4 sm:$0xff]   ;;  %v2420_v28 = vld [vmem:[#allocation5 + $0x2c4] ss:$16 sps:$4 sm:$0xff]   ;;  %v2423_v29 = vld [vmem:[#allocation5 + $0x2cc] ss:$16 sps:$4 sm:$0xff]  }
  0x56   :  { %1293 = vmatprep.subr.bf16.mxu0 %v2334_v32  ;;  %1457 = vmatprep.subr.bf16.mxu1 %v2336_v33  ;;  %v64_v30 = vld [vmem:[#allocation2 + $0x18] sm:$0xff]  ;;  %v2421_v33 = vld [vmem:[#allocation5 + $0x2c8] ss:$16 sps:$4 sm:$0xff]   ;;  %s1964_s9 = sshll.u32 %s2714_s8, 4  ;;  %s1965_s9 = int_to_ptr.vmem [resolvable:$true] %s1964_s9 }
  0x57   :  { %v2418_v31 = vld [vmem:[#allocation5 + $0x2c0] ss:$16 sps:$4 sm:$0xff]   ;;  %v71_v32 = vpack.c.bf16 %v64_v30, %v64_v30  ;;  %v2444_v46 = vld [vmem:[#allocation5 + $0x344] ss:$16 sps:$4 sm:$0xff]   ;;  %s2678_s10 = scalar_lea.vmem %s1965_s9, 64  ;;  %p2683_p11 = scmp.lt.s32.totalorder %s1965_s9, %s1965_s9 }
  0x58   :  { %v2442_v48 = vld [vmem:[#allocation5 + $0x340] ss:$16 sps:$4 sm:$0xff]   ;;  %v2474_v2 = vld [vmem:[#allocation5 + $0x3e4] ss:$16 sps:$4 sm:$0xff]   ;;  %p2679_p10 = scmp.ne.s32.totalorder %s1965_s9, %s2678_s10  ;;  %p2684_p12 = scmp.lt.s32.totalorder %s2678_s10, %s2678_s10 }
  0x59   :  { %1294 = vmatpush1.bf16.msra.mxu0 %v2338_v34  ;;  %1458 = vmatpush1.bf16.msra.mxu1 %v2339_v35  ;;  %v2426_v34 = vld [vmem:[#allocation5 + $0x2e4] ss:$16 sps:$4 sm:$0xff]   ;;  %v2429_v35 = vld [vmem:[#allocation5 + $0x2ec] ss:$16 sps:$4 sm:$0xff]  }
  0x5a   :  { %1295 = vmatprep.subr.bf16.mxu0 %v2340_v36  ;;  %1459 = vmatprep.subr.bf16.mxu1 %v2342_v37  ;;  %v2424_v36 = vld [vmem:[#allocation5 + $0x2e0] ss:$16 sps:$4 sm:$0xff]   ;;  %v2427_v37 = vld [vmem:[#allocation5 + $0x2e8] ss:$16 sps:$4 sm:$0xff]   ;;  %v2510_v30 = vld [vmem:[#allocation5 + $0x4a4] ss:$16 sps:$4 sm:$0xff]   ;;  %p2685_p13 = por %p2684_p12, %p2683_p11 }
  0x5c   :  { %p2686_p0 = pnand %p2685_p13, %p2679_p10 }
  0x5d   :  { %1296 = vmatpush1.bf16.msra.mxu0 %v2344_v38  ;;  %1460 = vmatpush1.bf16.msra.mxu1 %v2345_v39  ;;  %v2432_v38 = vld [vmem:[#allocation5 + $0x304] ss:$16 sps:$4 sm:$0xff]   ;;  %v2435_v39 = vld [vmem:[#allocation5 + $0x30c] ss:$16 sps:$4 sm:$0xff]  }
  0x5e   :  { %1297 = vmatprep.subr.bf16.mxu0 %v2346_v40  ;;  %1461 = vmatprep.subr.bf16.mxu1 %v2348_v41  ;;  %v2430_v40 = vld [vmem:[#allocation5 + $0x300] ss:$16 sps:$4 sm:$0xff]   ;;  %v2433_v41 = vld [vmem:[#allocation5 + $0x308] ss:$16 sps:$4 sm:$0xff]  }
  0x61   :  { %1298 = vmatpush1.bf16.msra.mxu0 %v2350_v42  ;;  %1462 = vmatpush1.bf16.msra.mxu1 %v2351_v43  ;;  %v2438_v42 = vld [vmem:[#allocation5 + $0x324] ss:$16 sps:$4 sm:$0xff]   ;;  %v2441_v43 = vld [vmem:[#allocation5 + $0x32c] ss:$16 sps:$4 sm:$0xff]  }
  0x62   :  { %1299 = vmatprep.subr.bf16.mxu0 %v2352_v44  ;;  %1463 = vmatprep.subr.bf16.mxu1 %v2354_v45  ;;  %v2436_v44 = vld [vmem:[#allocation5 + $0x320] ss:$16 sps:$4 sm:$0xff]   ;;  %v2439_v45 = vld [vmem:[#allocation5 + $0x328] ss:$16 sps:$4 sm:$0xff]  }
  0x65   :  { %1300 = vmatpush1.bf16.msra.mxu0 %v2356_v47  ;;  %1464 = vmatpush1.bf16.msra.mxu1 %v2357_v49  ;;  %v2447_v47 = vld [vmem:[#allocation5 + $0x34c] ss:$16 sps:$4 sm:$0xff]   ;;  %v2445_v49 = vld [vmem:[#allocation5 + $0x348] ss:$16 sps:$4 sm:$0xff]  }
  0x66   :  { %1301 = vmatprep.subr.bf16.mxu0 %v2358_v50  ;;  %1465 = vmatprep.subr.bf16.mxu1 %v2360_v51  ;;  %v2450_v50 = vld [vmem:[#allocation5 + $0x364] ss:$16 sps:$4 sm:$0xff]   ;;  %v2453_v51 = vld [vmem:[#allocation5 + $0x36c] ss:$16 sps:$4 sm:$0xff]  }
  0x69   :  { %1302 = vmatpush1.bf16.msra.mxu0 %v2362_v52  ;;  %1466 = vmatpush1.bf16.msra.mxu1 %v2363_v53  ;;  %v2448_v52 = vld [vmem:[#allocation5 + $0x360] ss:$16 sps:$4 sm:$0xff]   ;;  %v2451_v53 = vld [vmem:[#allocation5 + $0x368] ss:$16 sps:$4 sm:$0xff]  }
  0x6a   :  { %1303 = vmatprep.subr.bf16.mxu0 %v2364_v54  ;;  %1467 = vmatprep.subr.bf16.mxu1 %v2366_v55  ;;  %v2456_v54 = vld [vmem:[#allocation5 + $0x384] ss:$16 sps:$4 sm:$0xff]   ;;  %v2459_v55 = vld [vmem:[#allocation5 + $0x38c] ss:$16 sps:$4 sm:$0xff]  }
  0x6d   :  { %1304 = vmatpush1.bf16.msra.mxu0 %v2368_v56  ;;  %1468 = vmatpush1.bf16.msra.mxu1 %v2369_v57  ;;  %v2454_v56 = vld [vmem:[#allocation5 + $0x380] ss:$16 sps:$4 sm:$0xff]   ;;  %v2457_v57 = vld [vmem:[#allocation5 + $0x388] ss:$16 sps:$4 sm:$0xff]  }
  0x6e   :  { %1305 = vmatprep.subr.bf16.mxu0 %v2370_v58  ;;  %1469 = vmatprep.subr.bf16.mxu1 %v2372_v59  ;;  %v2462_v58 = vld [vmem:[#allocation5 + $0x3a4] ss:$16 sps:$4 sm:$0xff]   ;;  %v2465_v59 = vld [vmem:[#allocation5 + $0x3ac] ss:$16 sps:$4 sm:$0xff]  }
  0x71   :  { %1306 = vmatpush1.bf16.msra.mxu0 %v2374_v60  ;;  %1470 = vmatpush1.bf16.msra.mxu1 %v2375_v61  ;;  %v2460_v60 = vld [vmem:[#allocation5 + $0x3a0] ss:$16 sps:$4 sm:$0xff]   ;;  %v2463_v61 = vld [vmem:[#allocation5 + $0x3a8] ss:$16 sps:$4 sm:$0xff]  }
  0x72   :  { %1307 = vmatprep.subr.bf16.mxu0 %v2376_v62  ;;  %1471 = vmatprep.subr.bf16.mxu1 %v2378_v63  ;;  %v2468_v62 = vld [vmem:[#allocation5 + $0x3c4] ss:$16 sps:$4 sm:$0xff]   ;;  %v2471_v63 = vld [vmem:[#allocation5 + $0x3cc] ss:$16 sps:$4 sm:$0xff]  }
  0x75   :  { %1308 = vmatpush1.bf16.msra.mxu0 %v2380_v0  ;;  %1472 = vmatpush1.bf16.msra.mxu1 %v2381_v1  ;;  %v2466_v0 = vld [vmem:[#allocation5 + $0x3c0] ss:$16 sps:$4 sm:$0xff]   ;;  %v2469_v1 = vld [vmem:[#allocation5 + $0x3c8] ss:$16 sps:$4 sm:$0xff]  }
  0x76   :  { %1318 = vmatprep.subr.bf16.mxu0 %v2384_v3  ;;  %1482 = vmatprep.subr.bf16.mxu1 %v2387_v4  ;;  %v2477_v3 = vld [vmem:[#allocation5 + $0x3ec] ss:$16 sps:$4 sm:$0xff]   ;;  %v2472_v4 = vld [vmem:[#allocation5 + $0x3e0] ss:$16 sps:$4 sm:$0xff]  }
  0x78   :  { %1310 = vmatmul.mubr.bf16.vlgmr.msra.gmra.mrb[0].mxu0 %v68_v5  ;;  %1474 = vmatmul.mubr.bf16.vlgmr.msra.gmra.mrb[0].mxu1 %v68_v5  ;;  %v2475_v5 = vld [vmem:[#allocation5 + $0x3e8] ss:$16 sps:$4 sm:$0xff]  }
  0x79   :  { %1319 = vmatpush1.bf16.msra.mxu0 %v2382_v6  ;;  %1483 = vmatpush1.bf16.msra.mxu1 %v2385_v7  ;;  %v2480_v6 = vld [vmem:[#allocation5 + $0x404] ss:$16 sps:$4 sm:$0xff]   ;;  %v63_v7 = vld [vmem:[#allocation2 + $0x10] sm:$0xff] }
  0x7a   :  { %1320 = vmatprep.subr.bf16.mxu0 %v2390_v8  ;;  %1484 = vmatprep.subr.bf16.mxu1 %v2393_v9  ;;  %v2483_v8 = vld [vmem:[#allocation5 + $0x40c] ss:$16 sps:$4 sm:$0xff]   ;;  %v2478_v9 = vld [vmem:[#allocation5 + $0x400] ss:$16 sps:$4 sm:$0xff]  }
  0x7b   :  { %1350 = vmatprep.mubr.bf16.mxu0 %v71_v32  ;;  %1514 = vmatprep.mubr.bf16.mxu1 %v71_v32  ;;  %v2508_v32 = vld [vmem:[#allocation5 + $0x4a0] ss:$16 sps:$4 sm:$0xff]  }
  0x7d   :  { %1321 = vmatpush1.bf16.msra.mxu0 %v2388_v10  ;;  %1485 = vmatpush1.bf16.msra.mxu1 %v2391_v11  ;;  %v70_v10 = vpack.c.bf16 %v63_v7, %v63_v7  ;;  %v2481_v11 = vld [vmem:[#allocation5 + $0x408] ss:$16 sps:$4 sm:$0xff]   ;;  %v2573_v7 = vld [vmem:[#allocation5 + $0x5ec] ss:$16 sps:$4 sm:$0xff]  }
  0x7e   :  { %1322 = vmatprep.subr.bf16.mxu0 %v2396_v12  ;;  %1486 = vmatprep.subr.bf16.mxu1 %v2399_v13  ;;  %v2486_v12 = vld [vmem:[#allocation5 + $0x424] ss:$16 sps:$4 sm:$0xff]   ;;  %v2489_v13 = vld [vmem:[#allocation5 + $0x42c] ss:$16 sps:$4 sm:$0xff]  }
  0x81   :  { %1323 = vmatpush1.bf16.msra.mxu0 %v2394_v14  ;;  %1487 = vmatpush1.bf16.msra.mxu1 %v2397_v15  ;;  %v66_v14 = vld [vmem:[#allocation2 + $0x28] sm:$0xff] }
  0x82   :  { %1324 = vmatprep.subr.bf16.mxu0 %v2402_v16  ;;  %1488 = vmatprep.subr.bf16.mxu1 %v2405_v17  ;;  %v73_v15 = vpack.c.bf16 %v66_v14, %v66_v14  ;;  %v2484_v16 = vld [vmem:[#allocation5 + $0x420] ss:$16 sps:$4 sm:$0xff]   ;;  %v2487_v17 = vld [vmem:[#allocation5 + $0x428] ss:$16 sps:$4 sm:$0xff]  }
  0x83   :  { %v2574_v14 = vld [vmem:[#allocation5 + $0x600] ss:$16 sps:$4 sm:$0xff]  }
  0x85   :  { %1325 = vmatpush1.bf16.msra.mxu0 %v2400_v18  ;;  %1489 = vmatpush1.bf16.msra.mxu1 %v2403_v19  ;;  %v2492_v18 = vld [vmem:[#allocation5 + $0x444] ss:$16 sps:$4 sm:$0xff]   ;;  %v2495_v19 = vld [vmem:[#allocation5 + $0x44c] ss:$16 sps:$4 sm:$0xff]  }
  0x86   :  { %1326 = vmatprep.subr.bf16.mxu0 %v2408_v20  ;;  %1490 = vmatprep.subr.bf16.mxu1 %v2411_v21  ;;  %v2490_v20 = vld [vmem:[#allocation5 + $0x440] ss:$16 sps:$4 sm:$0xff]   ;;  %v2493_v21 = vld [vmem:[#allocation5 + $0x448] ss:$16 sps:$4 sm:$0xff]  }
  0x89   :  { %1327 = vmatpush1.bf16.msra.mxu0 %v2406_v22  ;;  %1491 = vmatpush1.bf16.msra.mxu1 %v2409_v23  ;;  %v2498_v22 = vld [vmem:[#allocation5 + $0x464] ss:$16 sps:$4 sm:$0xff]   ;;  %v2501_v23 = vld [vmem:[#allocation5 + $0x46c] ss:$16 sps:$4 sm:$0xff]  }
  0x8a   :  { %1328 = vmatprep.subr.bf16.mxu0 %v2414_v24  ;;  %1492 = vmatprep.subr.bf16.mxu1 %v2417_v25  ;;  %v2496_v24 = vld [vmem:[#allocation5 + $0x460] ss:$16 sps:$4 sm:$0xff]   ;;  %v2499_v25 = vld [vmem:[#allocation5 + $0x468] ss:$16 sps:$4 sm:$0xff]  }
  0x8d   :  { %1329 = vmatpush1.bf16.msra.mxu0 %v2412_v26  ;;  %1493 = vmatpush1.bf16.msra.mxu1 %v2415_v27  ;;  %v2504_v26 = vld [vmem:[#allocation5 + $0x484] ss:$16 sps:$4 sm:$0xff]   ;;  %v2507_v27 = vld [vmem:[#allocation5 + $0x48c] ss:$16 sps:$4 sm:$0xff]  }
  0x8e   :  { %1330 = vmatprep.subr.bf16.mxu0 %v2420_v28  ;;  %1494 = vmatprep.subr.bf16.mxu1 %v2423_v29  ;;  %v2502_v28 = vld [vmem:[#allocation5 + $0x480] ss:$16 sps:$4 sm:$0xff]   ;;  %v2505_v29 = vld [vmem:[#allocation5 + $0x488] ss:$16 sps:$4 sm:$0xff]  }
  0x91   :  { %1331 = vmatpush1.bf16.msra.mxu0 %v2418_v31  ;;  %1495 = vmatpush1.bf16.msra.mxu1 %v2421_v33  ;;  %v2513_v31 = vld [vmem:[#allocation5 + $0x4ac] ss:$16 sps:$4 sm:$0xff]   ;;  %v2511_v33 = vld [vmem:[#allocation5 + $0x4a8] ss:$16 sps:$4 sm:$0xff]  }
  0x92   :  { %1332 = vmatprep.subr.bf16.mxu0 %v2426_v34  ;;  %1496 = vmatprep.subr.bf16.mxu1 %v2429_v35  ;;  %v2516_v34 = vld [vmem:[#allocation5 + $0x4c4] ss:$16 sps:$4 sm:$0xff]   ;;  %v2519_v35 = vld [vmem:[#allocation5 + $0x4cc] ss:$16 sps:$4 sm:$0xff]  }
  0x95   :  { %1333 = vmatpush1.bf16.msra.mxu0 %v2424_v36  ;;  %1497 = vmatpush1.bf16.msra.mxu1 %v2427_v37  ;;  %v2514_v36 = vld [vmem:[#allocation5 + $0x4c0] ss:$16 sps:$4 sm:$0xff]   ;;  %v2517_v37 = vld [vmem:[#allocation5 + $0x4c8] ss:$16 sps:$4 sm:$0xff]  }
  0x96   :  { %1334 = vmatprep.subr.bf16.mxu0 %v2432_v38  ;;  %1498 = vmatprep.subr.bf16.mxu1 %v2435_v39  ;;  %v2522_v38 = vld [vmem:[#allocation5 + $0x4e4] ss:$16 sps:$4 sm:$0xff]   ;;  %v2525_v39 = vld [vmem:[#allocation5 + $0x4ec] ss:$16 sps:$4 sm:$0xff]  }
  0x99   :  { %1335 = vmatpush1.bf16.msra.mxu0 %v2430_v40  ;;  %1499 = vmatpush1.bf16.msra.mxu1 %v2433_v41  ;;  %v2520_v40 = vld [vmem:[#allocation5 + $0x4e0] ss:$16 sps:$4 sm:$0xff]   ;;  %v2523_v41 = vld [vmem:[#allocation5 + $0x4e8] ss:$16 sps:$4 sm:$0xff]  }
  0x9a   :  { %1336 = vmatprep.subr.bf16.mxu0 %v2438_v42  ;;  %1500 = vmatprep.subr.bf16.mxu1 %v2441_v43  ;;  %v2528_v42 = vld [vmem:[#allocation5 + $0x504] ss:$16 sps:$4 sm:$0xff]   ;;  %v2531_v43 = vld [vmem:[#allocation5 + $0x50c] ss:$16 sps:$4 sm:$0xff]  }
  0x9d   :  { %1337 = vmatpush1.bf16.msra.mxu0 %v2436_v44  ;;  %1501 = vmatpush1.bf16.msra.mxu1 %v2439_v45  ;;  %v2526_v44 = vld [vmem:[#allocation5 + $0x500] ss:$16 sps:$4 sm:$0xff]   ;;  %v2529_v45 = vld [vmem:[#allocation5 + $0x508] ss:$16 sps:$4 sm:$0xff]  }
  0x9e   :  { %1338 = vmatprep.subr.bf16.mxu0 %v2444_v46  ;;  %1502 = vmatprep.subr.bf16.mxu1 %v2447_v47  ;;  %v2534_v46 = vld [vmem:[#allocation5 + $0x524] ss:$16 sps:$4 sm:$0xff]   ;;  %v2537_v47 = vld [vmem:[#allocation5 + $0x52c] ss:$16 sps:$4 sm:$0xff]  }
  0xa1   :  { %1339 = vmatpush1.bf16.msra.mxu0 %v2442_v48  ;;  %1503 = vmatpush1.bf16.msra.mxu1 %v2445_v49  ;;  %v2532_v48 = vld [vmem:[#allocation5 + $0x520] ss:$16 sps:$4 sm:$0xff]   ;;  %v2535_v49 = vld [vmem:[#allocation5 + $0x528] ss:$16 sps:$4 sm:$0xff]  }
  0xa2   :  { %1340 = vmatprep.subr.bf16.mxu0 %v2450_v50  ;;  %1504 = vmatprep.subr.bf16.mxu1 %v2453_v51  ;;  %v2540_v50 = vld [vmem:[#allocation5 + $0x544] ss:$16 sps:$4 sm:$0xff]   ;;  %v2543_v51 = vld [vmem:[#allocation5 + $0x54c] ss:$16 sps:$4 sm:$0xff]  }
  0xa5   :  { %1341 = vmatpush1.bf16.msra.mxu0 %v2448_v52  ;;  %1505 = vmatpush1.bf16.msra.mxu1 %v2451_v53  ;;  %v2538_v52 = vld [vmem:[#allocation5 + $0x540] ss:$16 sps:$4 sm:$0xff]   ;;  %v2541_v53 = vld [vmem:[#allocation5 + $0x548] ss:$16 sps:$4 sm:$0xff]  }
  0xa6   :  { %1342 = vmatprep.subr.bf16.mxu0 %v2456_v54  ;;  %1506 = vmatprep.subr.bf16.mxu1 %v2459_v55  ;;  %v2546_v54 = vld [vmem:[#allocation5 + $0x564] ss:$16 sps:$4 sm:$0xff]   ;;  %v2549_v55 = vld [vmem:[#allocation5 + $0x56c] ss:$16 sps:$4 sm:$0xff]  }
  0xa9   :  { %1343 = vmatpush1.bf16.msra.mxu0 %v2454_v56  ;;  %1507 = vmatpush1.bf16.msra.mxu1 %v2457_v57  ;;  %v2544_v56 = vld [vmem:[#allocation5 + $0x560] ss:$16 sps:$4 sm:$0xff]   ;;  %v2547_v57 = vld [vmem:[#allocation5 + $0x568] ss:$16 sps:$4 sm:$0xff]  }
  0xaa   :  { %1344 = vmatprep.subr.bf16.mxu0 %v2462_v58  ;;  %1508 = vmatprep.subr.bf16.mxu1 %v2465_v59  ;;  %v2552_v58 = vld [vmem:[#allocation5 + $0x584] ss:$16 sps:$4 sm:$0xff]   ;;  %v2555_v59 = vld [vmem:[#allocation5 + $0x58c] ss:$16 sps:$4 sm:$0xff]  }
  0xad   :  { %1345 = vmatpush1.bf16.msra.mxu0 %v2460_v60  ;;  %1509 = vmatpush1.bf16.msra.mxu1 %v2463_v61  ;;  %v2550_v60 = vld [vmem:[#allocation5 + $0x580] ss:$16 sps:$4 sm:$0xff]   ;;  %v2553_v61 = vld [vmem:[#allocation5 + $0x588] ss:$16 sps:$4 sm:$0xff]  }
  0xae   :  { %1346 = vmatprep.subr.bf16.mxu0 %v2468_v62  ;;  %1510 = vmatprep.subr.bf16.mxu1 %v2471_v63  ;;  %v2558_v62 = vld [vmem:[#allocation5 + $0x5a4] ss:$16 sps:$4 sm:$0xff]   ;;  %v2561_v63 = vld [vmem:[#allocation5 + $0x5ac] ss:$16 sps:$4 sm:$0xff]  }
  0xb1   :  { %1347 = vmatpush1.bf16.msra.mxu0 %v2466_v0  ;;  %1511 = vmatpush1.bf16.msra.mxu1 %v2469_v1  ;;  %v2556_v0 = vld [vmem:[#allocation5 + $0x5a0] ss:$16 sps:$4 sm:$0xff]   ;;  %v2559_v1 = vld [vmem:[#allocation5 + $0x5a8] ss:$16 sps:$4 sm:$0xff]  }
  0xb2   :  { %1348 = vmatprep.subr.bf16.mxu0 %v2474_v2  ;;  %1512 = vmatprep.subr.bf16.mxu1 %v2477_v3  ;;  %v2564_v2 = vld [vmem:[#allocation5 + $0x5c4] ss:$16 sps:$4 sm:$0xff]   ;;  %v2567_v3 = vld [vmem:[#allocation5 + $0x5cc] ss:$16 sps:$4 sm:$0xff]  }
  0xb5   :  { %1349 = vmatpush1.bf16.msra.mxu0 %v2472_v4  ;;  %1513 = vmatpush1.bf16.msra.mxu1 %v2475_v5  ;;  %v2562_v4 = vld [vmem:[#allocation5 + $0x5c0] ss:$16 sps:$4 sm:$0xff]   ;;  %v2565_v5 = vld [vmem:[#allocation5 + $0x5c8] ss:$16 sps:$4 sm:$0xff]  }
  0xb6   :  { %1359 = vmatprep.subr.bf16.mxu0 %v2480_v6  ;;  %1523 = vmatprep.subr.bf16.mxu1 %v2483_v8  ;;  %v2570_v6 = vld [vmem:[#allocation5 + $0x5e4] ss:$16 sps:$4 sm:$0xff]   ;;  %v2568_v8 = vld [vmem:[#allocation5 + $0x5e0] ss:$16 sps:$4 sm:$0xff]  }
  0xb8   :  { %1351 = vmatmul.mubr.bf16.vlgmr.msra.gmra.mrb[0].mxu0 %v70_v10  ;;  %1515 = vmatmul.mubr.bf16.vlgmr.msra.gmra.mrb[0].mxu1 %v70_v10  ;;  %v65_v10 = vld [vmem:[#allocation2 + $0x20] sm:$0xff] }
  0xb9   :  { %1360 = vmatpush1.bf16.msra.mxu0 %v2478_v9  ;;  %1524 = vmatpush1.bf16.msra.mxu1 %v2481_v11  ;;  %v2571_v9 = vld [vmem:[#allocation5 + $0x5e8] ss:$16 sps:$4 sm:$0xff]   ;;  %v2576_v11 = vld [vmem:[#allocation5 + $0x604] ss:$16 sps:$4 sm:$0xff]  }
  0xba   :  { %1361 = vmatprep.subr.bf16.mxu0 %v2486_v12  ;;  %1525 = vmatprep.subr.bf16.mxu1 %v2489_v13  ;;  %v2579_v12 = vld [vmem:[#allocation5 + $0x60c] ss:$16 sps:$4 sm:$0xff]   ;;  %v72_v13 = vpack.c.bf16 %v65_v10, %v65_v10 }
  0xbb   :  { %1391 = vmatprep.mubr.bf16.mxu0 %v73_v15  ;;  %1555 = vmatprep.mubr.bf16.mxu1 %v73_v15  ;;  %v2577_v15 = vld [vmem:[#allocation5 + $0x608] ss:$16 sps:$4 sm:$0xff]  }
  0xbd   :  { %1362 = vmatpush1.bf16.msra.mxu0 %v2484_v16  ;;  %1526 = vmatpush1.bf16.msra.mxu1 %v2487_v17  ;;  %v2580_v16 = vld [vmem:[#allocation7 + $0x40] sm:$0xff]  }
  0xbe   :  { %1363 = vmatprep.subr.bf16.mxu0 %v2492_v18  ;;  %1527 = vmatprep.subr.bf16.mxu1 %v2495_v19  ;;  %v2581_v17 = vld [vmem:[#allocation7 + $0xc0] sm:$0xff]   ;;  %v2713_v18 = vmov 0   ;;  %v67_v19 = vld [vmem:[#allocation2 + $0x30] sm:$0xff] }
  0xc1   :  { %1364 = vmatpush1.bf16.msra.mxu0 %v2490_v20  ;;  %1528 = vmatpush1.bf16.msra.mxu1 %v2493_v21  ;;  %v74_v20 = vpack.c.bf16 %v67_v19, %v67_v19  ;;  %v2582_v21 = vld [vmem:[#allocation7] sm:$0xff]  }
  0xc2   :  { %1365 = vmatprep.subr.bf16.mxu0 %v2498_v22  ;;  %1529 = vmatprep.subr.bf16.mxu1 %v2501_v23  ;;  %v2583_v22 = vld [vmem:[#allocation7 + $0x80] sm:$0xff]   ;;  %v2584_v23 = vld [vmem:[#allocation7 + $0x48] sm:$0xff]  }
  0xc5   :  { %1366 = vmatpush1.bf16.msra.mxu0 %v2496_v24  ;;  %1530 = vmatpush1.bf16.msra.mxu1 %v2499_v25  ;;  %v2585_v24 = vld [vmem:[#allocation7 + $0xc8] sm:$0xff]  }
  0xc6   :  { %1367 = vmatprep.subr.bf16.mxu0 %v2504_v26  ;;  %1531 = vmatprep.subr.bf16.mxu1 %v2507_v27  ;;  %v2586_v25 = vld [vmem:[#allocation7 + $0x8] sm:$0xff]   ;;  %v2588_v27 = vld [vmem:[#allocation7 + $0x50] sm:$0xff]  }
  0xc7   :  { %v2587_v26 = vld [vmem:[#allocation7 + $0x88] sm:$0xff]  }
  0xc9   :  { %1368 = vmatpush1.bf16.msra.mxu0 %v2502_v28  ;;  %1532 = vmatpush1.bf16.msra.mxu1 %v2505_v29  ;;  %v2589_v28 = vld [vmem:[#allocation7 + $0xd0] sm:$0xff]  }
  0xca   :  { %1369 = vmatprep.subr.bf16.mxu0 %v2510_v30  ;;  %1533 = vmatprep.subr.bf16.mxu1 %v2513_v31  ;;  %v2590_v29 = vld [vmem:[#allocation7 + $0x10] sm:$0xff]   ;;  %v2592_v31 = vld [vmem:[#allocation7 + $0x58] sm:$0xff]  }
  0xcb   :  { %v2591_v30 = vld [vmem:[#allocation7 + $0x90] sm:$0xff]  }
  0xcd   :  { %1370 = vmatpush1.bf16.msra.mxu0 %v2508_v32  ;;  %1534 = vmatpush1.bf16.msra.mxu1 %v2511_v33  ;;  %v2593_v32 = vld [vmem:[#allocation7 + $0xd8] sm:$0xff]  }
  0xce   :  { %1371 = vmatprep.subr.bf16.mxu0 %v2516_v34  ;;  %1535 = vmatprep.subr.bf16.mxu1 %v2519_v35  ;;  %v2594_v33 = vld [vmem:[#allocation7 + $0x18] sm:$0xff]   ;;  %v2596_v35 = vld [vmem:[#allocation7 + $0x60] sm:$0xff]  }
  0xcf   :  { %v2595_v34 = vld [vmem:[#allocation7 + $0x98] sm:$0xff]  }
  0xd1   :  { %1372 = vmatpush1.bf16.msra.mxu0 %v2514_v36  ;;  %1536 = vmatpush1.bf16.msra.mxu1 %v2517_v37  ;;  %v2597_v36 = vld [vmem:[#allocation7 + $0xe0] sm:$0xff]  }
  0xd2   :  { %1373 = vmatprep.subr.bf16.mxu0 %v2522_v38  ;;  %1537 = vmatprep.subr.bf16.mxu1 %v2525_v39  ;;  %v2598_v37 = vld [vmem:[#allocation7 + $0x20] sm:$0xff]   ;;  %v2600_v39 = vld [vmem:[#allocation7 + $0x68] sm:$0xff]  }
  0xd3   :  { %v2599_v38 = vld [vmem:[#allocation7 + $0xa0] sm:$0xff]  }
  0xd5   :  { %1374 = vmatpush1.bf16.msra.mxu0 %v2520_v40  ;;  %1538 = vmatpush1.bf16.msra.mxu1 %v2523_v41  ;;  %v2601_v40 = vld [vmem:[#allocation7 + $0xe8] sm:$0xff]  }
  0xd6   :  { %1375 = vmatprep.subr.bf16.mxu0 %v2528_v42  ;;  %1539 = vmatprep.subr.bf16.mxu1 %v2531_v43  ;;  %v2602_v41 = vld [vmem:[#allocation7 + $0x28] sm:$0xff]   ;;  %v2604_v43 = vld [vmem:[#allocation7 + $0x70] sm:$0xff]  }
  0xd7   :  { %v2603_v42 = vld [vmem:[#allocation7 + $0xa8] sm:$0xff]  }
  0xd9   :  { %1376 = vmatpush1.bf16.msra.mxu0 %v2526_v44  ;;  %1540 = vmatpush1.bf16.msra.mxu1 %v2529_v45  ;;  %v2605_v44 = vld [vmem:[#allocation7 + $0xf0] sm:$0xff]  }
  0xda   :  { %1377 = vmatprep.subr.bf16.mxu0 %v2534_v46  ;;  %1541 = vmatprep.subr.bf16.mxu1 %v2537_v47  ;;  %v2606_v45 = vld [vmem:[#allocation7 + $0x30] sm:$0xff]   ;;  %v2608_v47 = vld [vmem:[#allocation7 + $0x78] sm:$0xff]  }
  0xdb   :  { %v2607_v46 = vld [vmem:[#allocation7 + $0xb0] sm:$0xff]  }
  0xdd   :  { %1378 = vmatpush1.bf16.msra.mxu0 %v2532_v48  ;;  %1542 = vmatpush1.bf16.msra.mxu1 %v2535_v49  ;;  %v2609_v48 = vld [vmem:[#allocation7 + $0xf8] sm:$0xff]  }
  0xde   :  { %1379 = vmatprep.subr.bf16.mxu0 %v2540_v50  ;;  %1543 = vmatprep.subr.bf16.mxu1 %v2543_v51  ;;  %v2610_v49 = vld [vmem:[#allocation7 + $0x38] sm:$0xff]   ;;  %v273_v51 = vlaneseq }
  0xdf   :  { %v2611_v50 = vld [vmem:[#allocation7 + $0xb8] sm:$0xff]  }
  0xe1   :  { %1380 = vmatpush1.bf16.msra.mxu0 %v2538_v52  ;;  %1544 = vmatpush1.bf16.msra.mxu1 %v2541_v53  ;;  %v274_v52 = vshrl.u32 %v273_v51, 7 }
  0xe2   :  { %1381 = vmatprep.subr.bf16.mxu0 %v2546_v54  ;;  %1545 = vmatprep.subr.bf16.mxu1 %v2549_v55  ;;  %v271_v55 = vld [vmem:[%s2801_s2] sm:$0xf] }
  0xe3   :  { %v275_v53 = vsub.s32 0, %v274_v52  ;;  %v283_v54 = vsub.s32 2, %v274_v52 }
  0xe5   :  { %1382 = vmatpush1.bf16.msra.mxu0 %v2544_v56  ;;  %1546 = vmatpush1.bf16.msra.mxu1 %v2547_v57  ;;  %v279_v56 = vsub.s32 1, %v274_v52  ;;  %v287_v57 = vsub.s32 3, %v274_v52 }
  0xe6   :  { %1383 = vmatprep.subr.bf16.mxu0 %v2552_v58  ;;  %1547 = vmatprep.subr.bf16.mxu1 %v2555_v59  ;;  %v276_v58 = vrot.slane %v271_v55, %v275_v53  ;;  %v284_v59 = vrot.slane %v271_v55, %v283_v54 }
  0xe9   :  { %1384 = vmatpush1.bf16.msra.mxu0 %v2550_v60  ;;  %1548 = vmatpush1.bf16.msra.mxu1 %v2553_v61  ;;  %v280_v60 = vrot.slane %v271_v55, %v279_v56  ;;  %v288_v61 = vrot.slane %v271_v55, %v287_v57 }
  0xea   :  { %1385 = vmatprep.subr.bf16.mxu0 %v2558_v62  ;;  %1549 = vmatprep.subr.bf16.mxu1 %v2561_v63 }
  0xed   :  { %1386 = vmatpush1.bf16.msra.mxu0 %v2556_v0  ;;  %1550 = vmatpush1.bf16.msra.mxu1 %v2559_v1 }
  0xee   :  { %1387 = vmatprep.subr.bf16.mxu0 %v2564_v2  ;;  %1551 = vmatprep.subr.bf16.mxu1 %v2567_v3 }
  0xf1   :  { %1388 = vmatpush1.bf16.msra.mxu0 %v2562_v4  ;;  %1552 = vmatpush1.bf16.msra.mxu1 %v2565_v5 }
  0xf2   :  { %1389 = vmatprep.subr.bf16.mxu0 %v2570_v6  ;;  %1553 = vmatprep.subr.bf16.mxu1 %v2573_v7 }
  0xf5   :  { %1390 = vmatpush1.bf16.msra.mxu0 %v2568_v8  ;;  %1554 = vmatpush1.bf16.msra.mxu1 %v2571_v9 }
  0xf6   :  { %1400 = vmatprep.subr.bf16.mxu0 %v2576_v11  ;;  %1564 = vmatprep.subr.bf16.mxu1 %v2579_v12 }
  0xf8   :  { %1392 = vmatmul.mubr.bf16.vlgmr.msra.gmra.mrb[0].mxu0 %v72_v13  ;;  %1556 = vmatmul.mubr.bf16.vlgmr.msra.gmra.mrb[0].mxu1 %v72_v13 }
  0xf9   :  { %1401 = vmatpush1.bf16.msra.mxu0 %v2574_v14  ;;  %1565 = vmatpush1.bf16.msra.mxu1 %v2577_v15 }
  0xfa   :  { %1432 = vmatprep.mubr.bf16.mxu0 %v2713_v18  ;;  %1596 = vmatprep.mubr.bf16.mxu1 %v2713_v18 }
  0xfb   :  { %2205 = vmatprep.subr.bf16.mxu0 %v2580_v16  ;;  %2227 = vmatprep.subr.bf16.mxu1 %v2581_v17 }
 0x104   :  { %2170 = vmatmul.mubr.msk.bf16.vlgmr.msra.gmra.mrb[0].mxu0 %vm1273_vm0, %v74_v20  ;;  %2171 = vmatmul.mubr.msk.bf16.vlgmr.msra.gmra.mrb[0].mxu1 %vm1273_vm0, %v74_v20  ;;  %v2172_v20 = vld [vmem:[%s2803_s4] ss:$0 sm:$0xff] }
 0x105   :  { %2206 = vmatpush3.bf16.msra.mxu0 %v2582_v21  ;;  %2228 = vmatpush3.bf16.msra.mxu1 %v2583_v22 }
 0x106   :  { %2207 = vmatprep.subr.bf16.mxu0 %v2584_v23  ;;  %2229 = vmatprep.subr.bf16.mxu1 %v2585_v24 }
 0x109   :  { %2208 = vmatpush3.bf16.msra.mxu0 %v2586_v25  ;;  %2230 = vmatpush3.bf16.msra.mxu1 %v2587_v26 }
 0x10a   :  { %2209 = vmatprep.subr.bf16.mxu0 %v2588_v27  ;;  %2231 = vmatprep.subr.bf16.mxu1 %v2589_v28 }
 0x10d   :  { %2210 = vmatpush3.bf16.msra.mxu0 %v2590_v29  ;;  %2232 = vmatpush3.bf16.msra.mxu1 %v2591_v30 }
 0x10e   :  { %2211 = vmatprep.subr.bf16.mxu0 %v2592_v31  ;;  %2233 = vmatprep.subr.bf16.mxu1 %v2593_v32 }
 0x111   :  { %2212 = vmatpush3.bf16.msra.mxu0 %v2594_v33  ;;  %2234 = vmatpush3.bf16.msra.mxu1 %v2595_v34 }
 0x112   :  { %2213 = vmatprep.subr.bf16.mxu0 %v2596_v35  ;;  %2235 = vmatprep.subr.bf16.mxu1 %v2597_v36 }
 0x115   :  { %2214 = vmatpush3.bf16.msra.mxu0 %v2598_v37  ;;  %2236 = vmatpush3.bf16.msra.mxu1 %v2599_v38 }
 0x116   :  { %2215 = vmatprep.subr.bf16.mxu0 %v2600_v39  ;;  %2237 = vmatprep.subr.bf16.mxu1 %v2601_v40 }
 0x119   :  { %2216 = vmatpush3.bf16.msra.mxu0 %v2602_v41  ;;  %2238 = vmatpush3.bf16.msra.mxu1 %v2603_v42 }
 0x11a   :  { %2217 = vmatprep.subr.bf16.mxu0 %v2604_v43  ;;  %2239 = vmatprep.subr.bf16.mxu1 %v2605_v44 }
 0x11d   :  { %2218 = vmatpush3.bf16.msra.mxu0 %v2606_v45  ;;  %2240 = vmatpush3.bf16.msra.mxu1 %v2607_v46 }
 0x11e   :  { %2219 = vmatprep.subr.bf16.mxu0 %v2608_v47  ;;  %2241 = vmatprep.subr.bf16.mxu1 %v2609_v48 }
 0x121   :  { %2220 = vmatpush3.bf16.msra.mxu0 %v2610_v49  ;;  %2242 = vmatpush3.bf16.msra.mxu1 %v2611_v50 }
 0x1d7   :  { %v1434_v62 = vpop.f32.mrb[0].mxu0  ;;  %v1598_v63 = vpop.f32.mrb[0].mxu1 }
 0x1d8   :  { %v2249_v0 = vadd.f32 %v1434_v62, %v276_v58  ;;  %v2251_v1 = vadd.f32 %v1598_v63, %v284_v59  ;;  %v1436_v2 = vpop.f32.mrb[1].mxu0  ;;  %v1600_v3 = vpop.f32.mrb[1].mxu1 }
 0x1d9   :  { %v2250_v4 = vadd.f32 %v1436_v2, %v280_v60  ;;  %v2252_v5 = vadd.f32 %v1600_v3, %v288_v61  ;;  %v1438_v6 = vpop.f32.mrb[2].mxu0  ;;  %v1602_v7 = vpop.f32.mrb[2].mxu1 }
 0x1da   :  { %v1605_v8 = vmax.f32 %v2249_v0, 0.0  ;;  %v1607_v9 = vmax.f32 %v2251_v1, 0.0  ;;  %v1439_v10 = vpop.f32.mrb[3].mxu0  ;;  %v1603_v11 = vpop.f32.mrb[3].mxu1 }
 0x1db   :  { %v1606_v12 = vmax.f32 %v2250_v4, 0.0  ;;  %v1608_v13 = vmax.f32 %v2252_v5, 0.0 }
 0x1dc   :  { %v1609_v16 = vpack.c.bf16 %v1605_v8, %v1605_v8  ;;  %v1611_v17 = vpack.c.bf16 %v1607_v9, %v1607_v9 }
 0x1dd   :  { %v1610_v14 = vpack.c.bf16 %v1606_v12, %v1606_v12  ;;  %v1612_v15 = vpack.c.bf16 %v1608_v13, %v1608_v13 }
 0x1df   :  { %1908 = vmatprep.mubr.bf16.mxu0 %v1610_v14  ;;  %1948 = vmatprep.mubr.bf16.mxu1 %v1612_v15 }
 0x1e0   :  { %1909 = vmatmul.mubr.bf16.vlgmr.msra.gmra.mrb[4].mxu0 %v1609_v16  ;;  %1949 = vmatmul.mubr.bf16.vlgmr.msra.gmra.mrb[4].mxu1 %v1611_v17 }
 0x2b3   :  { %v2221_v18 = vpop.f32.mrb[4].mxu0  ;;  %v2243_v19 = vpop.f32.mrb[4].mxu1 }
 0x2b4   :  { %v2222_v21 = vpop.f32.mrb[5].mxu0  ;;  %v2244_v22 = vpop.f32.mrb[5].mxu1 }
 0x2b5   :  { %v2223_v23 = vadd.f32 %v2222_v21, %v2221_v18  ;;  %v2245_v24 = vadd.f32 %v2244_v22, %v2243_v19  ;;  %v2224_v25 = vpop.f32.mrb[6].mxu0  ;;  %v2246_v26 = vpop.f32.mrb[6].mxu1 }
 0x2b6   :  { %v2225_v27 = vpop.f32.mrb[7].mxu0  ;;  %v2247_v28 = vpop.f32.mrb[7].mxu1 }
 0x2b7   :  { %v1911_v29 = vadd.f32 %v2223_v23, %v2172_v20 }
 0x2b9   :  { %v1951_v30 = vadd.f32 %v2245_v24, %v1911_v29 }
 0x2bb   :  { %v1956_v31 = vpack.c.bf16 %v1951_v30, %v1951_v30 }
 0x2bd   :  { %1957 = vst [vmem:[#allocation8] sm:$0xf] %v1956_v31 }
 0x2be   :  { %2689 = shalt.err (!%p2686_p0)
}
 0x2bf   :  { %s2690_s12 = scalar_lea.hbm %s2804_s5, 64 }
 0x2c0   :  { %p2691_p1 = scmp.ne.s32.totalorder %s2804_s5, %s2690_s12  ;;  %p2694_p2 = scmp.lt.u32.totalorder %s2690_s12, %s2804_s5 }
 0x2c2   :  { %p2696_p3 = pnand %p2694_p2, %p2691_p1 }
 0x2c4   :  { %2699 = shalt.err (!%p2696_p3)
}
 0x2c5   :  { %1967 = dma.vmem_to_hbm [thread:$0]  %s1965_s9, 64, %s2804_s5, [#allocation4]  }
 0x2c6   :  { %2704 = dma.done.wait [#allocation4], 64  }
 0x2c7   :  { %2705 = vsyncadd [#allocation4], 4294967232 }
 0x2c8   :  { %1971 = vsyncpa [#allocation3], 1 }
 0x2c9   :  { %1972 = vsyncpa [#allocation6], 1 }
 0x2ca   :  { %1973 = vsyncpa [#allocation4], 1 }

</bundles_post_ra>
